<compile_context>
chip_gen: v7x
topology: tpu7x:2x2x1
jax: 0.10.0
libtpu: 0.0.40
codegen_flags: <defaults>
</compile_context>

<pallas_src>
import jax
import jax.numpy as jnp
from jax import lax
from jax.experimental import pallas as pl
from jax.experimental.pallas import tpu as pltpu

MAX_PAD = 3                    # largest halo (kernel_size=7 -> pad 3)
TAPS = 2 * MAX_PAD + 1         # 7
LANE = 128


def multiscale_conv_kernel(x_ref, w_ref, b_ref, o_ref):
    # x_ref : (C_in, TILE_L + 2*MAX_PAD)  halo'd input tile, native dtype
    # w_ref : (3*C_out, TAPS*C_in)        fused per-tap weights (zero-padded taps)
    # b_ref : (3*C_out, 1)                fused biases
    # o_ref : (C_out, TILE_L)             output tile (L on lanes -> lane-dense stores)
    c_out, t = o_ref.shape
    x = x_ref[...]                                   # keep native dtype; MXU casts for free

    # im2col: 7 shifted views stacked along the channel/sublane axis -> one tall contraction.
    cols = [x[:, k:k + t] for k in range(TAPS)]
    patches = jnp.concatenate(cols, axis=0)          # (TAPS*C_in, TILE_L)

    # Single fused matmul for all three branches (f32 accumulation on the MXU).
    y = jnp.dot(w_ref[...], patches,
                preferred_element_type=jnp.float32)  # (3*C_out, TILE_L)
    y = y + b_ref[...].astype(jnp.float32)           # one bias add for all branches
    y = jnp.maximum(y, 0.0)                          # per-branch ReLU (branches are disjoint rows)

    out = y[:c_out] + y[c_out:2 * c_out] + y[2 * c_out:]
    o_ref[...] = out.astype(o_ref.dtype)


def _fuse_weights(w3, w5, w7):
    """PyTorch Conv1d weights (C_out, C_in, K) -> fused (3*C_out, TAPS*C_in)."""
    c_out, c_in, _ = w3.shape

    def embed(w, k):
        pad = (k - 1) // 2
        off = MAX_PAD - pad
        wt = jnp.transpose(w, (0, 2, 1))                       # (C_out, K, C_in)
        wt = jnp.pad(wt, ((0, 0), (off, TAPS - k - off), (0, 0)))  # taps placed in 7-wide frame
        return wt.reshape(c_out, TAPS * c_in)

    return jnp.concatenate([embed(w3, 3), embed(w5, 5), embed(w7, 7)], axis=0)


def multiscale_conv(x_ncl, w3, b3, w5, b5, w7, b7, *, tile_l=None):
    """x_ncl: (N, C_in, L) like PyTorch NCL. wK: (C_out, C_in, K). Returns (N, C_out, L)."""
    n, c_in, length = x_ncl.shape
    c_out = w3.shape[0]

    # Tile size along L: multiple of 128 (lane-dense), capped at 512 (VMEM-friendly on v5e/v7x).
    if tile_l is None:
        tile_l = min(512, ((length + LANE - 1) // LANE) * LANE)
    tile_l = max(LANE, (tile_l // LANE) * LANE)
    l_pad = ((length + tile_l - 1) // tile_l) * tile_l
    n_lt = l_pad // tile_l

    # Halo padding + pre-materialized overlapping L tiles so every BlockSpec DMA stays a plain
    # rectangular copy (safe to lower); extra HBM copy is ~(tile+6)/tile of the input.
    # TODO(synk): switch to pl.Element overlapping-window indexing to drop this extra HBM copy.
    x_p = jnp.pad(x_ncl, ((0, 0), (0, 0), (MAX_PAD, MAX_PAD + l_pad - length)))
    x_blocks = jnp.stack(
        [x_p[:, :, i * tile_l: i * tile_l + tile_l + 2 * MAX_PAD] for i in range(n_lt)],
        axis=1)                                            # (N, n_lt, C_in, tile_l + 6)

    w_big = _fuse_weights(w3, w5, w7)                      # (3*C_out, TAPS*C_in)
    b_big = jnp.concatenate([b3, b5, b7]).reshape(3 * c_out, 1)

    out_pad = pl.pallas_call(
        multiscale_conv_kernel,
        out_shape=jax.ShapeDtypeStruct((n, c_out, l_pad), x_ncl.dtype),
        grid=(n, n_lt),
        in_specs=[
            pl.BlockSpec((None, None, c_in, tile_l + 2 * MAX_PAD),
                         lambda i, j: (i, j, 0, 0)),
            pl.BlockSpec((3 * c_out, TAPS * c_in), lambda i, j: (0, 0)),
            pl.BlockSpec((3 * c_out, 1), lambda i, j: (0, 0)),
        ],
        out_specs=pl.BlockSpec((None, c_out, tile_l), lambda i, j: (i, 0, j)),
        compiler_params=pltpu.CompilerParams(
            dimension_semantics=("parallel", "parallel"),
            vmem_limit_bytes=32 * 1024 * 1024),
    )(x_blocks, w_big, b_big)

    return out_pad[:, :, :length]


def _reference(x_ncl, w, b, pad):
    y = lax.conv_general_dilated(
        x_ncl, w, window_strides=(1,), padding=[(pad, pad)],
        dimension_numbers=('NCW', 'OIW', 'NCW'))
    return jnp.maximum(y + b.reshape(1, -1, 1), 0.0)


if __name__ == "__main__":
    key = jax.random.PRNGKey(0)
    N, Cin, Cout = 2, 4, 8
    kx, k3w, k3b, k5w, k5b, k7w, k7b = jax.random.split(key, 7)

    # PyTorch Conv1d-shaped params: (C_out, C_in, K), bias (C_out,)
    w3 = jax.random.normal(k3w, (Cout, Cin, 3), jnp.float32) * 0.1
    b3 = jax.random.normal(k3b, (Cout,), jnp.float32) * 0.1
    w5 = jax.random.normal(k5w, (Cout, Cin, 5), jnp.float32) * 0.1
    b5 = jax.random.normal(k5b, (Cout,), jnp.float32) * 0.1
    w7 = jax.random.normal(k7w, (Cout, Cin, 7), jnp.float32) * 0.1
    b7 = jax.random.normal(k7b, (Cout,), jnp.float32) * 0.1

    # (L, tile_l): small base case + a case that exercises multiple L tiles / L not 128-aligned.
    for L, tile_l in ((16, None), (200, 128)):
        x = jax.random.normal(jax.random.fold_in(kx, L), (N, Cin, L), jnp.float32)
        out = multiscale_conv(x, w3, b3, w5, b5, w7, b7, tile_l=tile_l)
        out = jax.block_until_ready(out)

        ref = (_reference(x, w3, b3, 1)
               + _reference(x, w5, b5, 2)
               + _reference(x, w7, b7, 3))
        assert out.shape == (N, Cout, L)
        assert jnp.allclose(out, ref, atol=1e-4, rtol=1e-4), f"mismatch vs. reference (L={L})"

    print("KERNEL_OK")
</pallas_src>

<mosaic_0001>
module attributes {stable_mosaic.version = 11 : i64} {
  func.func @multiscale_conv_kernel(%arg0: i32, %arg1: i32, %arg2: memref<1x1x4x134xf32, #tpu.memory_space<vmem>>, %arg3: memref<24x28xf32, #tpu.memory_space<vmem>>, %arg4: memref<24x1xf32, #tpu.memory_space<vmem>>, %arg5: memref<1x8x128xf32, #tpu.memory_space<vmem>>) attributes {dimension_semantics = [#tpu.dimension_semantics<parallel>, #tpu.dimension_semantics<parallel>], iteration_bounds = array<i64: 2, 1>, scalar_prefetch = 0 : i64, scratch_operands = 0 : i64, tpu.core_type = #tpu.core_type<tc>, window_params = [{transform_indices = @transform_0, window_bounds = array<i64: 1, 1, 4, 134>}, {pipeline_mode = #tpu.pipeline_mode<synchronous>, transform_indices = @transform_1, window_bounds = array<i64: 24, 28>}, {pipeline_mode = #tpu.pipeline_mode<synchronous>, transform_indices = @transform_2, window_bounds = array<i64: 24, 1>}, {transform_indices = @transform_3, window_bounds = array<i64: 1, 8, 128>}]} {
    %c0 = arith.constant 0 : index
    %c0_0 = arith.constant 0 : index
    %c0_1 = arith.constant 0 : index
    %c0_2 = arith.constant 0 : index
    %0 = vector.load %arg2[%c0, %c0_0, %c0_1, %c0_2] : memref<1x1x4x134xf32, #tpu.memory_space<vmem>>, vector<1x1x4x134xf32>
    %1 = vector.shape_cast %0 : vector<1x1x4x134xf32> to vector<4x134xf32>
    %2 = vector.extract_strided_slice %1 {offsets = [0, 0], sizes = [4, 128], strides = [1, 1]} : vector<4x134xf32> to vector<4x128xf32>
    %3 = vector.extract_strided_slice %1 {offsets = [0, 1], sizes = [4, 128], strides = [1, 1]} : vector<4x134xf32> to vector<4x128xf32>
    %4 = vector.extract_strided_slice %1 {offsets = [0, 2], sizes = [4, 128], strides = [1, 1]} : vector<4x134xf32> to vector<4x128xf32>
    %5 = vector.extract_strided_slice %1 {offsets = [0, 3], sizes = [4, 128], strides = [1, 1]} : vector<4x134xf32> to vector<4x128xf32>
    %6 = vector.extract_strided_slice %1 {offsets = [0, 4], sizes = [4, 128], strides = [1, 1]} : vector<4x134xf32> to vector<4x128xf32>
    %7 = vector.extract_strided_slice %1 {offsets = [0, 5], sizes = [4, 128], strides = [1, 1]} : vector<4x134xf32> to vector<4x128xf32>
    %8 = vector.extract_strided_slice %1 {offsets = [0, 6], sizes = [4, 128], strides = [1, 1]} : vector<4x134xf32> to vector<4x128xf32>
    %9 = tpu.concatenate %2, %3, %4, %5, %6, %7, %8 in 0 : vector<4x128xf32>, vector<4x128xf32>, vector<4x128xf32>, vector<4x128xf32>, vector<4x128xf32>, vector<4x128xf32>, vector<4x128xf32> -> vector<28x128xf32>
    %c0_3 = arith.constant 0 : index
    %c0_4 = arith.constant 0 : index
    %10 = vector.load %arg3[%c0_3, %c0_4] : memref<24x28xf32, #tpu.memory_space<vmem>>, vector<24x28xf32>
    %cst = arith.constant dense<0.000000e+00> : vector<24x128xf32>
    %11 = tpu.matmul %10, %9, %cst {dimension_numbers = #tpu.dot_dimension_numbers<[1], [0], [0], [1], [0, 0, 1, 1], [], []>} : vector<24x28xf32>, vector<28x128xf32>, vector<24x128xf32> -> vector<24x128xf32>
    %c0_5 = arith.constant 0 : index
    %c0_6 = arith.constant 0 : index
    %12 = vector.load %arg4[%c0_5, %c0_6] : memref<24x1xf32, #tpu.memory_space<vmem>>, vector<24x1xf32>
    %13 = vector.broadcast %12 : vector<24x1xf32> to vector<24x128xf32>
    %14 = arith.addf %11, %13 : vector<24x128xf32>
    %cst_7 = arith.constant 0.000000e+00 : f32
    %15 = vector.broadcast %cst_7 : f32 to vector<24x128xf32>
    %16 = arith.maximumf %14, %15 : vector<24x128xf32>
    %17 = vector.extract_strided_slice %16 {offsets = [0, 0], sizes = [8, 128], strides = [1, 1]} : vector<24x128xf32> to vector<8x128xf32>
    %18 = vector.extract_strided_slice %16 {offsets = [8, 0], sizes = [8, 128], strides = [1, 1]} : vector<24x128xf32> to vector<8x128xf32>
    %19 = arith.addf %17, %18 : vector<8x128xf32>
    %20 = vector.extract_strided_slice %16 {offsets = [16, 0], sizes = [8, 128], strides = [1, 1]} : vector<24x128xf32> to vector<8x128xf32>
    %21 = arith.addf %19, %20 : vector<8x128xf32>
    %c0_8 = arith.constant 0 : index
    %c0_9 = arith.constant 0 : index
    %c0_10 = arith.constant 0 : index
    %22 = vector.load %arg5[%c0_8, %c0_9, %c0_10] : memref<1x8x128xf32, #tpu.memory_space<vmem>>, vector<1x8x128xf32>
    %23 = vector.shape_cast %22 : vector<1x8x128xf32> to vector<8x128xf32>
    %24 = vector.shape_cast %21 : vector<8x128xf32> to vector<1x8x128xf32>
    tpu.vector_store %arg5[%c0_8, %c0_9, %c0_10], %24 {strides = array<i32>} : memref<1x8x128xf32, #tpu.memory_space<vmem>>, vector<1x8x128xf32>,
    return
  }
  func.func @transform_0(%arg0: i32, %arg1: i32) -> (i32, i32, i32, i32) {
    %c0_i32 = arith.constant 0 : i32
    %c0_i32_0 = arith.constant 0 : i32
    %c0_i32_1 = arith.constant 0 : i32
    return %arg0, %arg1, %c0_i32, %c0_i32_0 : i32, i32, i32, i32
  }
  func.func @transform_1(%arg0: i32, %arg1: i32) -> (i32, i32) {
    %c0_i32 = arith.constant 0 : i32
    %c0_i32_0 = arith.constant 0 : i32
    %c0_i32_1 = arith.constant 0 : i32
    return %c0_i32, %c0_i32_0 : i32, i32
  }
  func.func @transform_2(%arg0: i32, %arg1: i32) -> (i32, i32) {
    %c0_i32 = arith.constant 0 : i32
    %c0_i32_0 = arith.constant 0 : i32
    %c0_i32_1 = arith.constant 0 : i32
    return %c0_i32, %c0_i32_0 : i32, i32
  }
  func.func @transform_3(%arg0: i32, %arg1: i32) -> (i32, i32, i32) {
    %c0_i32 = arith.constant 0 : i32
    %c0_i32_0 = arith.constant 0 : i32
    return %arg0, %c0_i32, %arg1 : i32, i32, i32
  }
}

</mosaic_0001>

<bundles_post_ra>
// kernel: tpu_custom_call.1
= control target key start
LH: loop header
LB: loop body
LE: loop exit
PB: predicated region body
PF: predicated region fallthrough
CT: control target
= control target key end

     0   :  { %8 = vsyncpa [#allocation3], 0  ;;  %s987_s0 = inlined_call_operand.hbm [shape: f32[2,1,4,134], index: 0, kind: input, shape index: {}]   ;;  %s988_s1 = inlined_call_operand.vmem [shape: f32[24,28], index: 1, kind: input, shape index: {}]   ;;  %s989_s2 = inlined_call_operand.vmem [shape: f32[24,1], index: 2, kind: input, shape index: {}]   ;;  %s990_s3 = inlined_call_operand.hbm [shape: f32[2,8,128], index: 3, kind: output, shape index: {}]  }
   0x1   :  { %10 = vsyncpa [#allocation3 + $0x1], 0 }
   0x2   :  { %11 = vsyncpa [#allocation4], 0 }
   0x3   :  { %13 = vsyncpa [#allocation4 + $0x1], 0  ;;  %s778_s12 = smov 0   ;;  %s780_s13 = smov 0  }
   0x4   :  { %s782_s14 = smov 0   ;;  %s784_s15 = smov 0  }
   0x5   :  { %s786_s16 = smov 0   ;;  %s788_s17 = smov 0  }
   0x6 LB: > { %s470_s18 = sadd.s32 4294967295, %s743_s17   ;;  %s471_s19 = sadd.s32 4294967294, %s743_s17   ;;  %s743_s17 = sphi %s788_s17, %s19_s17   ;;  %s739_s16 = sphi %s786_s16, %s1006_s16   ;;  %s735_s15 = sphi %s784_s15, %s1005_s15   ;;  %s731_s14 = sphi %s782_s14, %s1004_s14   ;;  %s727_s13 = sphi %s780_s13, %s1003_s13   ;;  %s723_s12 = sphi %s778_s12, %s1002_s12  }
   0x7   : > { %s31_s20 = sadd.s32 1, %s739_s16  ;;  %s40_s21 = sadd.s32 1, %s731_s14 }
   0x8   : > { %p33_p0 = scmp.ge.s32.totalorder %s31_s20, 2  ;;  %p47_p1 = scmp.ne.s32.totalorder %s731_s14, %s727_s13 }
   0x9   : > { %p48_p2 = scmp.eq.s32.totalorder %s743_s17, 0  ;;  %p53_p3 = scmp.ne.s32.totalorder %s727_s13, %s723_s12 }
   0xa   : > { %s1008_s20 = smov (%p33_p0, %s31_s20), 0  ;;  %p54_p5 = scmp.eq.s32.totalorder %s470_s18, 0 }
   0xb   : > { %p819_p4 = por %p48_p2, %p47_p1  ;;  %s35_s23 = ssub.s32 %s739_s16, %s1008_s20 }
   0xc   : > { %p121_p6 = scmp.eq.s32.totalorder %s470_s18, 1  ;;  %p38_p7 = scmp.eq.s32.totalorder %s35_s23, 0 }
   0xd   : > { %p825_p8 = por %p54_p5, %p53_p3  ;;  %p127_p10 = scmp.eq.s32.totalorder %s471_s19, 1 }
   0xe   : > { %p829_p9 = por %p121_p6, %p47_p1  ;;  %p536_p13 = scmp.lt.s32.totalorder %s743_s17, 2 }
   0xf   : > { %s834_s26 = scalar_select %p38_p7, %s731_s14, %s40_s21  }
  0x10   : > { %s994_s25 = scalar_select %p829_p9, 1, 0 }
  0x11   : > { %p836_p11 = por %p127_p10, %p53_p3  ;;  %s153_s28 = sand.u32 1, %s731_s14  }
  0x12   : > { %s474_s29 = sshll.u32 %s153_s28, 3  ;;  %s488_s30 = sshll.u32 %s739_s16, 7 }
  0x13   : > { %s995_s27 = scalar_select %p836_p11, 1, 0 }
  0x14   : > { %s847_s6 = scalar_lea.hbm %s987_s0, %s488_s30  ;;  %s157_s7 = scalar_lea.vmem [#allocation2], %s474_s29 }
  0x15   : > { %s167_s8 = sshll.u32 %s157_s7, 4  ;;  %p853_p0 = pnand %p536_p13, %p819_p4  ;;  %s849_s8 = int_to_ptr.vmem [resolvable:$true] %s167_s8 }
  0x16   : > { %s154_s10 = scalar_lea.sflag [#allocation3], %s153_s28  ;;  %s631_s11 = scalar_lea.hbm %s847_s6, 128 }
  0x17   : > { %p632_p3 = scmp.ne.s32.totalorder %s847_s6, %s631_s11  ;;  %p633_p5 = pneg %p853_p0 }
  0x18   : > { %s636_s21 = scalar_lea.hbm %s987_s0, 256  ;;  %p637_p4 = scmp.lt.u32.totalorder %s847_s6, %s987_s0 }
  0x19   : > { %p634_p6 = pnand %p633_p5, %p632_p3  ;;  %p638_p10 = scmp.lt.u32.totalorder %s636_s21, %s631_s11 }
  0x1a   : > { %p640_p12 = scmp.lt.u32.totalorder %s631_s11, %s847_s6 }
  0x1b   : > { %p635_p7 = pneg %p634_p6  ;;  %p639_p13 = por %p638_p10, %p637_p4 }
  0x1d   : > { %p641_p1 = por %p640_p12, %p639_p13 }
  0x1f   : > { %p642_p2 = pnand %p641_p1, %p635_p7 }
  0x21   : > { %645 = shalt.err (!%p642_p2)
}
  0x22   : > { %s646_s28 = scalar_lea.vmem %s849_s8, 128  ;;  %s745_s29 = smov [#allocation2]  }
  0x23   : > { %p647_p3 = scmp.ne.s32.totalorder %s849_s8, %s646_s28  ;;  %s651_s30 = sshll.u32 %s745_s29, 4  ;;  %s652_s30 = int_to_ptr.vmem [resolvable:$false] %s651_s30 }
  0x24   : > { %s653_s4 = scalar_lea.vmem %s652_s30, 256  ;;  %p654_p9 = scmp.lt.s32.totalorder %s849_s8, %s652_s30 }
  0x25   : > { %p649_p6 = pnand %p647_p3, %p633_p5  ;;  %p655_p4 = scmp.lt.s32.totalorder %s653_s4, %s646_s28 }
  0x27   : > { %p650_p11 = pneg %p649_p6  ;;  %p656_p10 = por %p655_p4, %p654_p9 }
  0x29   : > { %p657_p12 = pnand %p656_p10, %p650_p11 }
  0x2b   : > { %660 = shalt.err (!%p657_p12)
}
  0x2c   : > { %531 = dma.hbm_to_vmem [thread:$0]  (!%p853_p0), %s847_s6, 128, %s849_s8, %s154_s10  }
  0x2d   : > { %p997_p1 = scmp.lt.s32.totalorder %s743_s17, 3  ;;  %p998_p2 = scmp.ge.s32.totalorder %s743_s17, 1 }
  0x2f   : > { %p173_p5 = pnand %p998_p2, %p997_p1 }
  0x30   : > { %s889_s5 = sand.u32 (!%p173_p5), 1, %s727_s13  }
  0x31   : > { %176 = sbr.rel (%p173_p5) target bundleno = 431 (0x1af), region = 32  ;;  %s478_s7 = sshll.u32 (!%p173_p5), %s889_s5, 3 }
  0x32   : > { %s179_s11 = scalar_lea.sflag (!%p173_p5), [#allocation3], %s889_s5  ;;  %s182_s9 = scalar_lea.vmem (!%p173_p5), [#allocation2], %s478_s7 }
  0x38   : > { %714 = dma.done.wait (%p825_p8), %s179_s11, 128  }
  0x39   : > { %716 = vsyncadd (%p825_p8), %s179_s11, 4294967168  ;;  %v205_v0 = vld [vmem:[%s182_s9] sm:$0xff]  ;;  %v746_v3 = vmov 0.0|0.0   ;;  %s747_s6 = smov 127   ;;  %s748_s8 = smov 125   ;;  %vm749_vm0 = vmmov 0  }
  0x3a   : > { %v207_v1 = vcombine.low %v205_v0, %v205_v0  ;;  %v215_v2 = vcombine.high %v205_v0, %v205_v0  ;;  %513 = vmatprep.subr.bf16.mxu0 %v746_v3  ;;  %520 = vmatprep.subr.bf16.mxu1 %v746_v3  ;;  %v750_v6 = vmov 0.0   ;;  %s751_s24 = smov 126   ;;  %s752_s10 = smov 124   ;;  %v258_v7 = vld [vmem:[%s989_s2 + $0x8] sm:$0xff]  ;;  %v257_v8 = vld [vmem:[%s989_s2] sm:$0xff]  ;;  %v755_v9 = vmov 0  }
  0x3b   : > { %504 = vmatprep.mubr.msk.f32.mxu0 %vm749_vm0, %v750_v6  ;;  %507 = vmatprep.mubr.msk.f32.mxu1 %vm749_vm0, %v750_v6  ;;  %s753_s18 = smov 123   ;;  %s754_s19 = smov 122   ;;  %v259_v10 = vld [vmem:[%s989_s2 + $0x10] sm:$0xff]  ;;  %vm212_vm1 = vcmask 1039360   ;;  %vm220_vm2 = vcmask 1031168   ;;  %vm227_vm3 = vcmask 1022976  }
  0x3c   : > { %v597_v4 = vpack.i.bf16 %v205_v0, %v207_v1  ;;  %v602_v5 = vpack.i.bf16 %v215_v2, %v205_v0  ;;  %628 = vset.pattern.permute.xlu1 %v755_v9  ;;  %627 = vset.pattern.permute.xlu0 %v755_v9  ;;  %vm250_vm4 = vcmask 1043456   ;;  %vm234_vm5 = vcmask 1014784   ;;  %v254_v40 = vld [vmem:[%s988_s1] sm:$0xff]  ;;  %v255_v41 = vld [vmem:[%s988_s1 + $0x8] sm:$0xff]  ;;  %v256_v42 = vld [vmem:[%s988_s1 + $0x10] sm:$0xff]  ;;  %s374_s28 = scalar_lea.sflag [#allocation4], %s889_s5 }
  0x3d   : > { %vm241_vm6 = vcmask 1006592   ;;  %vm248_vm7 = vcmask 998400   ;;  %vm756_vm8 = vmmov 1   ;;  %vm275_vm10 = vcmask 228352   ;;  %p999_p9 = scmp.ne.s32.totalorder %s994_s25, 0 }
  0x3e   : > { %598 = vrot.lane.b32.xlu0 %v597_v4, %s747_s6  ;;  %608 = vrot.lane.b32.xlu1 %v597_v4, %s748_s8  ;;  %vm518_vm9 = vmpackc.low %vm250_vm4, %vm756_vm8 }
  0x42   : > { %603 = vrot.lane.b32.xlu0 %v602_v5, %s751_s24  ;;  %613 = vrot.lane.b32.xlu1 %v602_v5, %s752_s10  ;;  %s485_s10 = sshll.u32 %s735_s15, 7  ;;  %s757_s15 = smov [#allocation5]  }
  0x43   : > { %s938_s23 = scalar_lea.hbm %s990_s3, %s485_s10 }
  0x46   : > { %618 = vrot.lane.b32.xlu0 %v597_v4, %s753_s18  ;;  %623 = vrot.lane.b32.xlu1 %v602_v5, %s754_s19  ;;  %s204_s18 = scalar_lea.vmem [#allocation5], %s478_s7  ;;  %s665_s7 = sshll.u32 %s757_s15, 4  ;;  %s666_s7 = int_to_ptr.vmem [resolvable:$false] %s665_s7 }
  0x47   : > { %s388_s19 = sshll.u32 %s204_s18, 4  ;;  %s667_s30 = scalar_lea.vmem %s666_s7, 256  ;;  %s940_s19 = int_to_ptr.vmem [resolvable:$true] %s388_s19 }
  0x48   : > { %s661_s29 = scalar_lea.vmem %s940_s19, 128  ;;  %p668_p7 = scmp.lt.s32.totalorder %s940_s19, %s666_s7 }
  0x49   : > { %p662_p8 = scmp.ne.s32.totalorder %s940_s19, %s661_s29  ;;  %p669_p13 = scmp.lt.s32.totalorder %s667_s30, %s661_s29 }
  0x4a   : > { %267 = vperm.xlu1 %628, %v258_v7   ;;  %262 = vperm.xlu0 %627, %v257_v8  }
  0x4b   : > { %p663_p11 = pnand %p662_p8, %p999_p9  ;;  %p670_p3 = por %p669_p13, %p668_p7 }
  0x4d   : > { %p664_p0 = pneg %p663_p11 }
  0x4e   : > { %272 = vperm.xlu1 %628, %v259_v10  }
  0x4f   : > { %p671_p6 = pnand %p670_p3, %p664_p0 }
  0xb0   : > { %v599_v11 = vpop.permute.xlu0 %598  ;;  %v609_v12 = vpop.permute.xlu1 %608 }
  0xb1   : > { %v601_v13 = vunpack.i.h.bf16 %v599_v11  ;;  %v600_v14 = vunpack.i.l.bf16 %v599_v11  ;;  %v611_v15 = vunpack.i.h.bf16 %v609_v12  ;;  %v610_v16 = vunpack.i.l.bf16 %v609_v12 }
  0xb3   : > { %v213_v21 = vsel %vm212_vm1, %v600_v14, %v601_v13  ;;  %v228_v25 = vsel %vm227_vm3, %v610_v16, %v611_v15 }
  0xb4   : > { %v604_v17 = vpop.permute.xlu0 %603  ;;  %v614_v18 = vpop.permute.xlu1 %613  ;;  %v251_v28 = vsel %vm250_vm4, %v205_v0, %v213_v21 }
  0xb5   : > { %v606_v19 = vunpack.i.h.bf16 %v604_v17  ;;  %v605_v20 = vunpack.i.l.bf16 %v604_v17  ;;  %v616_v22 = vunpack.i.h.bf16 %v614_v18  ;;  %v615_v23 = vunpack.i.l.bf16 %v614_v18 }
  0xb7   : > { %v221_v24 = vsel %vm220_vm2, %v605_v20, %v606_v19  ;;  %v235_v35 = vsel %vm234_vm5, %v615_v23, %v616_v22 }
  0xb8   : > { %v619_v26 = vpop.permute.xlu0 %618  ;;  %v624_v27 = vpop.permute.xlu1 %623  ;;  %v252_v29 = vsel %vm250_vm4, %v221_v24, %v228_v25 }
  0xb9   : > { %v621_v30 = vunpack.i.h.bf16 %v619_v26  ;;  %v620_v31 = vunpack.i.l.bf16 %v619_v26  ;;  %v626_v32 = vunpack.i.h.bf16 %v624_v27  ;;  %v625_v33 = vunpack.i.l.bf16 %v624_v27 }
  0xba   : > { %v514_v34 = vpack.c.bf16 %v252_v29, %v251_v28 }
  0xbb   : > { %v242_v36 = vsel %vm241_vm6, %v620_v31, %v621_v30  ;;  %v249_v37 = vsel %vm248_vm7, %v625_v33, %v626_v32 }
  0xbc   : > { %515 = vmatpush3.bf16.msra.mxu0 %v514_v34  ;;  %522 = vmatpush3.bf16.msra.mxu1 %v514_v34  ;;  %v253_v38 = vsel %vm250_vm4, %v235_v35, %v242_v36 }
  0xbd   : > { %516 = vmatprep.subr.bf16.mxu0 %v746_v3  ;;  %521 = vmatprep.subr.bf16.mxu1 %v746_v3  ;;  %v517_v39 = vpack.c.bf16 %v249_v37, %v253_v38 }
  0xc0   : > { %519 = vmatpush3.bf16.msk.msra.mxu0 %vm518_vm9, %v517_v39  ;;  %523 = vmatpush3.bf16.msk.msra.mxu1 %vm518_vm9, %v517_v39 }
  0xc3   : > { %505 = vmatmul.mubr.msk.f32.vlgmr.msra.gmra.mrb[0].mxu0 %vm275_vm10, %v254_v40  ;;  %508 = vmatmul.mubr.msk.f32.vlgmr.msra.gmra.mrb[0].mxu1 %vm275_vm10, %v255_v41 }
  0xc4   : > { %510 = vmatprep.mubr.msk.f32.mxu1 %vm749_vm0, %v750_v6 }
  0xc7   : > { %511 = vmatmul.mubr.msk.f32.gmra.mrb[2].mxu1 %vm275_vm10, %v256_v42 }
  0xc9   : > { %v268_v43 = vpop.permute.xlu1 %267  ;;  %v263_v44 = vpop.permute.xlu0 %262 }
  0xcd   : > { %v273_v53 = vpop.permute.xlu1 %272 }
 0x196   : > { %v353_v45 = vpop.f32.mrb[0].mxu0  ;;  %v358_v46 = vpop.f32.mrb[0].mxu1 }
 0x197   : > { %v354_v47 = vadd.f32 %v353_v45, %v263_v44  ;;  %v359_v48 = vadd.f32 %v358_v46, %v268_v43  ;;  %v509_v49 = vpop.f32.mrb[1].mxu1  ;;  %v506_v50 = vpop.f32.mrb[1].mxu0 }
 0x199   : > { %v367_v51 = vmax.f32 %v354_v47, 0.0  ;;  %v368_v52 = vmax.f32 %v359_v48, 0.0 }
 0x19a   : > { %v363_v54 = vpop.f32.mrb[2].mxu1 }
 0x19b   : > { %v370_v55 = vadd.f32 %v368_v52, %v367_v51  ;;  %v364_v56 = vadd.f32 %v363_v54, %v273_v53  ;;  %v512_v57 = vpop.f32.mrb[3].mxu1 }
 0x19d   : > { %v369_v58 = vmax.f32 %v364_v56, 0.0 }
 0x19f   : > { %v371_v59 = vadd.f32 %v370_v55, %v369_v58 }
 0x1a1   : > { %372 = vst [vmem:[%s204_s18] sm:$0xff] %v371_v59 }
 0x1a2   : > { %674 = shalt.err (!%p671_p6)
}
 0x1a3   : > { %s675_s5 = scalar_lea.hbm %s938_s23, 128  ;;  %s679_s9 = scalar_lea.hbm %s990_s3, 256 }
 0x1a4   : > { %p676_p4 = scmp.ne.s32.totalorder %s938_s23, %s675_s5  ;;  %p680_p1 = scmp.lt.u32.totalorder %s938_s23, %s990_s3 }
 0x1a5   : > { %p681_p2 = scmp.lt.u32.totalorder %s679_s9, %s675_s5  ;;  %p683_p8 = scmp.lt.u32.totalorder %s675_s5, %s938_s23 }
 0x1a6   : > { %p677_p10 = pnand %p676_p4, %p999_p9 }
 0x1a7   : > { %p682_p5 = por %p681_p2, %p680_p1 }
 0x1a8   : > { %p678_p12 = pneg %p677_p10 }
 0x1a9   : > { %p684_p11 = por %p683_p8, %p682_p5 }
 0x1ab   : > { %p685_p0 = pnand %p684_p11, %p678_p12 }
 0x1ad   : > { %688 = shalt.err (!%p685_p0)
}
 0x1ae   : > { %526 = dma.vmem_to_hbm [thread:$0]  (%p999_p9), %s940_s19, 128, %s938_s23, %s374_s28  }
 0x1af PF: > { %s400_s24 = sand.u32 1, %s723_s12   ;;  %p1000_p7 = scmp.ne.s32.totalorder %s995_s27, 0 }
 0x1b0   : > { %p1001_p13 = scmp.ge.s32.totalorder %s743_s17, 2  ;;  %s401_s10 = scalar_lea.sflag [#allocation4], %s400_s24 }
 0x1b2   : > { %p533_p3 = pnand %p1001_p13, %p1000_p7 }
 0x1b4   : > { %718 = dma.done.wait (!%p533_p3), %s401_s10, 128  }
 0x1b5   : > { %720 = vsyncadd (!%p533_p3), %s401_s10, 4294967168  ;;  %s19_s17 = sadd.s32 1, %s743_s17   ;;  %s1002_s12 = smov %s727_s13 }
 0x1b6   : > { %p16_p6 = scmp.ge.s32.totalorder %s19_s17, 4   ;;  %s1003_s13 = smov %s731_s14 }
 0x1b7   : > { %s1004_s14 = smov %s834_s26  ;;  %s1005_s15 = smov %s739_s16 }
 0x1b8   : > { %s1006_s16 = smov %s1008_s20  ;;  %18 = sbr.rel (!%p16_p6) target bundleno = 6 (0x6), region = 77 }
 0x1bf   :  { %406 = vsyncpa [#allocation3], 1 }
 0x1c0   :  { %408 = vsyncpa [#allocation3 + $0x1], 1 }
 0x1c1   :  { %409 = vsyncpa [#allocation4], 1 }
 0x1c2   :  { %411 = vsyncpa [#allocation4 + $0x1], 1 }

</bundles_post_ra>
